<compile_context>
chip_gen: v7x
topology: tpu7x:2x2x1
jax: 0.10.0
libtpu: 0.0.40
codegen_flags: <defaults>
</compile_context>

<pallas_src>
import jax
import jax.numpy as jnp
from jax.experimental import pallas as pl
from jax.experimental.pallas import tpu as pltpu


HIDDEN_PAD = 128   # lane-dense hidden width (zero-padded, numerically inert)
ACTION_PAD = 128   # lane-dense internal logits width (masked with -1e30 bias)
NEG_INF = jnp.float32(-1e30)


def policy_kernel(x_ref, w1_ref, b1_ref, w2_ref, b2_ref, o_ref):
    # x_ref: [TB, S] f32, w1_ref: [S, HP] bf16, b1_ref: [1, HP] f32,
    # w2_ref: [HP, AP] bf16, b2_ref: [1, AP] f32 (padded lanes = -1e30),
    # o_ref:  [TB, A]  f32 (A = real action dim, only real lanes stored).
    A = o_ref.shape[-1]
    # In-kernel cast (VPU) -> bf16 MXU inputs, f32 accumulation.
    x = x_ref[...].astype(jnp.bfloat16)
    h = jnp.dot(x, w1_ref[...], preferred_element_type=jnp.float32)
    h = jnp.maximum(h + b1_ref[...], 0.0)
    logits = jnp.dot(h.astype(jnp.bfloat16), w2_ref[...],
                     preferred_element_type=jnp.float32)
    logits = logits + b2_ref[...]        # padded lanes -> ~-1e30 -> exp() == 0
    # Numerically-stable softmax over the last axis (matches nn.Softmax(dim=-1)).
    m = jnp.max(logits, axis=-1, keepdims=True)
    e = jnp.exp(logits - m)
    denom = jnp.sum(e, axis=-1, keepdims=True)
    probs = e / denom                    # exact normalization (rows sum to 1)
    o_ref[...] = probs[:, :A].astype(o_ref.dtype)


def _round_up(n, m):
    return ((n + m - 1) // m) * m


def policy_forward(x, w1, b1, w2, b2, *, block_b=4096):
    """x: [B, S] f32; w1: [S, 64]; b1: [64]; w2: [64, A]; b2: [A] (all f32)."""
    B, S = x.shape
    H = w1.shape[1]
    A = w2.shape[1]

    # --- pad hidden / action dims to 128 lanes (lane-dense MXU internally) ---
    w1p = jnp.zeros((S, HIDDEN_PAD), jnp.bfloat16).at[:, :H].set(
        w1.astype(jnp.bfloat16))
    b1p = jnp.zeros((1, HIDDEN_PAD), jnp.float32).at[:, :H].set(
        b1.reshape(1, H).astype(jnp.float32))
    w2p = jnp.zeros((HIDDEN_PAD, ACTION_PAD), jnp.bfloat16).at[:H, :A].set(
        w2.astype(jnp.bfloat16))
    b2p = jnp.full((1, ACTION_PAD), NEG_INF, jnp.float32).at[:, :A].set(
        b2.reshape(1, A).astype(jnp.float32))

    # --- tile the batch: TB multiple of 16, capped at block_b ---
    block_b = _round_up(block_b, 16)
    B16 = _round_up(B, 16)
    TB = min(block_b, B16)
    # Prefer >= 2 grid steps when the batch allows it (keeps both v7x TCs busy).
    if B16 > 16 and B16 <= 2 * block_b:
        TB = min(TB, _round_up(pl.cdiv(B16, 2), 16))
    B_pad = _round_up(B16, TB)
    x_p = x if B_pad == B else jnp.pad(x, ((0, B_pad - B), (0, 0)))
    grid = (B_pad // TB,)

    flops = 2 * B_pad * (S * HIDDEN_PAD + HIDDEN_PAD * ACTION_PAD)
    bytes_accessed = (4 * B_pad * S                      # x (f32, read)
                      + 4 * B_pad * A                    # out (f32, narrow write)
                      + 2 * (S * HIDDEN_PAD + HIDDEN_PAD * ACTION_PAD)  # weights
                      + 4 * (HIDDEN_PAD + ACTION_PAD))   # biases
    transcendentals = B_pad * ACTION_PAD

    out_padded = pl.pallas_call(
        policy_kernel,
        out_shape=jax.ShapeDtypeStruct((B_pad, A), jnp.float32),
        grid=grid,
        in_specs=[
            pl.BlockSpec((TB, S), lambda i: (i, 0)),                   # x: tiled
            pl.BlockSpec((S, HIDDEN_PAD), lambda i: (0, 0)),           # w1: resident
            pl.BlockSpec((1, HIDDEN_PAD), lambda i: (0, 0)),           # b1: resident
            pl.BlockSpec((HIDDEN_PAD, ACTION_PAD), lambda i: (0, 0)),  # w2: resident
            pl.BlockSpec((1, ACTION_PAD), lambda i: (0, 0)),           # b2: resident
        ],
        out_specs=pl.BlockSpec((TB, A), lambda i: (i, 0)),   # A == full last dim
        compiler_params=pltpu.CompilerParams(
            dimension_semantics=("parallel",)),   # shards grid over v7x's 2 TCs
        cost_estimate=pl.CostEstimate(
            flops=flops,
            bytes_accessed=bytes_accessed,
            transcendentals=transcendentals),
    )(x_p, w1p, b1p, w2p, b2p)

    # Slice off batch padding only (action dim is already the real width).
    return out_padded[:B, :]


def init_params(key, state_dim, action_dim, hidden=64):
    # Deterministic init mimicking PyTorch nn.Linear (uniform +/-1/sqrt(fan_in)).
    k1, k2, k3, k4 = jax.random.split(key, 4)
    lim1 = 1.0 / jnp.sqrt(state_dim)
    lim2 = 1.0 / jnp.sqrt(hidden)
    w1 = jax.random.uniform(k1, (state_dim, hidden), jnp.float32, -lim1, lim1)
    b1 = jax.random.uniform(k2, (hidden,), jnp.float32, -lim1, lim1)
    w2 = jax.random.uniform(k3, (hidden, action_dim), jnp.float32, -lim2, lim2)
    b2 = jax.random.uniform(k4, (action_dim,), jnp.float32, -lim2, lim2)
    return w1, b1, w2, b2


def reference_forward_f32(x, w1, b1, w2, b2):
    h = jnp.maximum(x @ w1 + b1, 0.0)
    return jax.nn.softmax(h @ w2 + b2, axis=-1)


def reference_forward_bf16(x, w1, b1, w2, b2):
    # Mirrors the kernel's precision choices: bf16 MXU inputs, f32 accumulation,
    # f32 elementwise/softmax.
    bf = jnp.bfloat16
    h = jnp.dot(x.astype(bf), w1.astype(bf),
                preferred_element_type=jnp.float32) + b1
    h = jnp.maximum(h, 0.0)
    logits = jnp.dot(h.astype(bf), w2.astype(bf),
                     preferred_element_type=jnp.float32) + b2
    return jax.nn.softmax(logits, axis=-1)


if __name__ == "__main__":
    state_dim, action_dim, batch = 16, 8, 2
    key = jax.random.PRNGKey(0)
    kx, kp = jax.random.split(key)
    x = jax.random.normal(kx, (batch, state_dim), jnp.float32)
    w1, b1, w2, b2 = init_params(kp, state_dim, action_dim)

    out = jax.block_until_ready(policy_forward(x, w1, b1, w2, b2))

    ref_bf = reference_forward_bf16(x, w1, b1, w2, b2)
    ref_f32 = reference_forward_f32(x, w1, b1, w2, b2)

    assert out.shape == (batch, action_dim)
    # Tight vs. the precision-matched reference.
    assert jnp.allclose(out, ref_bf, atol=5e-3, rtol=5e-3)
    # Loose vs. the full-f32 PyTorch-equivalent forward (bf16 MXU inputs).
    assert jnp.allclose(out, ref_f32, atol=2e-2, rtol=2e-2)
    # Valid probability distribution per row (exact division in-kernel).
    assert jnp.allclose(jnp.sum(out, axis=-1), 1.0, atol=1e-5)

    print("KERNEL_OK")
</pallas_src>

<mosaic_0001>
module attributes {stable_mosaic.version = 11 : i64} {
  func.func @policy_kernel(%arg0: i32, %arg1: memref<16x16xf32, #tpu.memory_space<vmem>>, %arg2: memref<16x128xbf16, #tpu.memory_space<vmem>>, %arg3: memref<1x128xf32, #tpu.memory_space<vmem>>, %arg4: memref<128x128xbf16, #tpu.memory_space<vmem>>, %arg5: memref<1x128xf32, #tpu.memory_space<vmem>>, %arg6: memref<16x8xf32, #tpu.memory_space<vmem>>) attributes {dimension_semantics = [#tpu.dimension_semantics<parallel>], iteration_bounds = array<i64: 1>, scalar_prefetch = 0 : i64, scratch_operands = 0 : i64, tpu.core_type = #tpu.core_type<tc>, window_params = [{transform_indices = @transform_0, window_bounds = array<i64: 16, 16>}, {pipeline_mode = #tpu.pipeline_mode<synchronous>, transform_indices = @transform_1, window_bounds = array<i64: 16, 128>}, {pipeline_mode = #tpu.pipeline_mode<synchronous>, transform_indices = @transform_2, window_bounds = array<i64: 1, 128>}, {pipeline_mode = #tpu.pipeline_mode<synchronous>, transform_indices = @transform_3, window_bounds = array<i64: 128, 128>}, {pipeline_mode = #tpu.pipeline_mode<synchronous>, transform_indices = @transform_4, window_bounds = array<i64: 1, 128>}, {transform_indices = @transform_5, window_bounds = array<i64: 16, 8>}]} {
    %c0 = arith.constant 0 : index
    %c0_0 = arith.constant 0 : index
    %0 = vector.load %arg1[%c0, %c0_0] : memref<16x16xf32, #tpu.memory_space<vmem>>, vector<16x16xf32>
    %1 = arith.truncf %0 : vector<16x16xf32> to vector<16x16xbf16>
    %c0_1 = arith.constant 0 : index
    %c0_2 = arith.constant 0 : index
    %2 = vector.load %arg2[%c0_1, %c0_2] : memref<16x128xbf16, #tpu.memory_space<vmem>>, vector<16x128xbf16>
    %cst = arith.constant dense<0.000000e+00> : vector<16x128xf32>
    %3 = tpu.matmul %1, %2, %cst {dimension_numbers = #tpu.dot_dimension_numbers<[1], [0], [0], [1], [0, 0, 1, 1], [], []>} : vector<16x16xbf16>, vector<16x128xbf16>, vector<16x128xf32> -> vector<16x128xf32>
    %c0_3 = arith.constant 0 : index
    %c0_4 = arith.constant 0 : index
    %4 = vector.load %arg3[%c0_3, %c0_4] : memref<1x128xf32, #tpu.memory_space<vmem>>, vector<1x128xf32>
    %5 = vector.broadcast %4 : vector<1x128xf32> to vector<16x128xf32>
    %6 = arith.addf %3, %5 : vector<16x128xf32>
    %cst_5 = arith.constant 0.000000e+00 : f32
    %7 = vector.broadcast %cst_5 : f32 to vector<16x128xf32>
    %8 = arith.maximumf %6, %7 : vector<16x128xf32>
    %9 = arith.truncf %8 : vector<16x128xf32> to vector<16x128xbf16>
    %c0_6 = arith.constant 0 : index
    %c0_7 = arith.constant 0 : index
    %10 = vector.load %arg4[%c0_6, %c0_7] : memref<128x128xbf16, #tpu.memory_space<vmem>>, vector<128x128xbf16>
    %cst_8 = arith.constant dense<0.000000e+00> : vector<16x128xf32>
    %11 = tpu.matmul %9, %10, %cst_8 {dimension_numbers = #tpu.dot_dimension_numbers<[1], [0], [0], [1], [0, 0, 1, 1], [], []>} : vector<16x128xbf16>, vector<128x128xbf16>, vector<16x128xf32> -> vector<16x128xf32>
    %c0_9 = arith.constant 0 : index
    %c0_10 = arith.constant 0 : index
    %12 = vector.load %arg5[%c0_9, %c0_10] : memref<1x128xf32, #tpu.memory_space<vmem>>, vector<1x128xf32>
    %13 = vector.broadcast %12 : vector<1x128xf32> to vector<16x128xf32>
    %14 = arith.addf %11, %13 : vector<16x128xf32>
    %cst_11 = arith.constant dense<0xFF800000> : vector<16xf32>
    %15 = vector.multi_reduction <maximumf>, %14, %cst_11 [1] : vector<16x128xf32> to vector<16xf32>
    %16 = vector.shape_cast %15 : vector<16xf32> to vector<16x1xf32>
    %17 = vector.broadcast %16 : vector<16x1xf32> to vector<16x128xf32>
    %18 = arith.subf %14, %17 : vector<16x128xf32>
    %19 = math.exp %18 : vector<16x128xf32>
    %cst_12 = arith.constant dense<0.000000e+00> : vector<16xf32>
    %20 = vector.multi_reduction <add>, %19, %cst_12 [1] : vector<16x128xf32> to vector<16xf32>
    %21 = vector.shape_cast %20 : vector<16xf32> to vector<16x1xf32>
    %22 = vector.broadcast %21 : vector<16x1xf32> to vector<16x128xf32>
    %23 = arith.divf %19, %22 : vector<16x128xf32>
    %24 = vector.extract_strided_slice %23 {offsets = [0, 0], sizes = [16, 8], strides = [1, 1]} : vector<16x128xf32> to vector<16x8xf32>
    %c0_13 = arith.constant 0 : index
    %c0_14 = arith.constant 0 : index
    %25 = vector.load %arg6[%c0_13, %c0_14] : memref<16x8xf32, #tpu.memory_space<vmem>>, vector<16x8xf32>
    tpu.vector_store %arg6[%c0_13, %c0_14], %24 {strides = array<i32>} : memref<16x8xf32, #tpu.memory_space<vmem>>, vector<16x8xf32>,
    return
  }
  func.func @transform_0(%arg0: i32) -> (i32, i32) {
    %c0_i32 = arith.constant 0 : i32
    %c0_i32_0 = arith.constant 0 : i32
    return %arg0, %c0_i32 : i32, i32
  }
  func.func @transform_1(%arg0: i32) -> (i32, i32) {
    %c0_i32 = arith.constant 0 : i32
    %c0_i32_0 = arith.constant 0 : i32
    %c0_i32_1 = arith.constant 0 : i32
    return %c0_i32, %c0_i32_0 : i32, i32
  }
  func.func @transform_2(%arg0: i32) -> (i32, i32) {
    %c0_i32 = arith.constant 0 : i32
    %c0_i32_0 = arith.constant 0 : i32
    %c0_i32_1 = arith.constant 0 : i32
    return %c0_i32, %c0_i32_0 : i32, i32
  }
  func.func @transform_3(%arg0: i32) -> (i32, i32) {
    %c0_i32 = arith.constant 0 : i32
    %c0_i32_0 = arith.constant 0 : i32
    %c0_i32_1 = arith.constant 0 : i32
    return %c0_i32, %c0_i32_0 : i32, i32
  }
  func.func @transform_4(%arg0: i32) -> (i32, i32) {
    %c0_i32 = arith.constant 0 : i32
    %c0_i32_0 = arith.constant 0 : i32
    %c0_i32_1 = arith.constant 0 : i32
    return %c0_i32, %c0_i32_0 : i32, i32
  }
  func.func @transform_5(%arg0: i32) -> (i32, i32) {
    %c0_i32 = arith.constant 0 : i32
    %c0_i32_0 = arith.constant 0 : i32
    return %arg0, %c0_i32 : i32, i32
  }
}

</mosaic_0001>

<bundles_post_ra>
// kernel: tpu_custom_call.1
= control target key start
LH: loop header
LB: loop body
LE: loop exit
PB: predicated region body
PF: predicated region fallthrough
CT: control target
= control target key end

     0   :  { %10 = vsyncpa [#allocation3], 0  ;;  %s505_s0 = inlined_call_operand.hbm [shape: f32[16,16], index: 0, kind: input, shape index: {}]   ;;  %s506_s1 = inlined_call_operand.hbm [shape: bf16[16,128], index: 1, kind: input, shape index: {}]   ;;  %s507_s2 = inlined_call_operand.vmem [shape: f32[1,128], index: 2, kind: input, shape index: {}]   ;;  %s508_s3 = inlined_call_operand.hbm [shape: bf16[128,128], index: 3, kind: input, shape index: {}]   ;;  %s509_s4 = inlined_call_operand.vmem [shape: f32[1,128], index: 4, kind: input, shape index: {}]   ;;  %s510_s5 = inlined_call_operand.vmem [shape: f32[16,8], index: 5, kind: output, shape index: {}]  }
   0x1   :  { %11 = vsyncpa [#allocation5], 0  ;;  %s412_s18 = smov [#allocation4]   ;;  %s342_s22 = scalar_lea.hbm %s506_s1, 128 }
   0x2   :  { %s29_s19 = sshll.u32 %s412_s18, 4  ;;  %p343_p0 = scmp.ne.s32.totalorder %s506_s1, %s342_s22  ;;  %s30_s19 = int_to_ptr.vmem [resolvable:$true] %s29_s19 }
   0x3   :  { %p346_p1 = scmp.lt.u32.totalorder %s342_s22, %s506_s1 }
   0x5   :  { %p348_p2 = pnand %p346_p1, %p343_p0 }
   0x7   :  { %351 = shalt.err (!%p348_p2)
}
   0x8   :  { %s352_s27 = scalar_lea.vmem %s30_s19, 128  ;;  %p357_p4 = scmp.lt.s32.totalorder %s30_s19, %s30_s19 }
   0x9   :  { %p353_p3 = scmp.ne.s32.totalorder %s30_s19, %s352_s27  ;;  %p358_p5 = scmp.lt.s32.totalorder %s352_s27, %s352_s27 }
   0xb   :  { %p359_p6 = por %p358_p5, %p357_p4 }
   0xd   :  { %p360_p7 = pnand %p359_p6, %p353_p3 }
   0xf   :  { %363 = shalt.err (!%p360_p7)
}
  0x10   :  { %s413_s28 = smov 64   ;;  %s414_s29 = smov 4  }
  0x11   :  { %35 = dma.hbm_to_vmem [thread:$0]  %s506_s1, 128, %s30_s19, [#allocation5], %s413_s28, %s413_s28, %s414_s29  }
  0x12   :  { %s415_s7 = smov [#allocation2]   ;;  %s364_s11 = scalar_lea.hbm %s505_s0, 256 }
  0x13   :  { %s17_s8 = sshll.u32 %s415_s7, 4  ;;  %p365_p8 = scmp.ne.s32.totalorder %s505_s0, %s364_s11  ;;  %s18_s8 = int_to_ptr.vmem [resolvable:$true] %s17_s8 }
  0x14   :  { %p368_p9 = scmp.lt.u32.totalorder %s364_s11, %s505_s0 }
  0x16   :  { %p370_p10 = pnand %p368_p9, %p365_p8 }
  0x18   :  { %373 = shalt.err (!%p370_p10)
}
  0x19   :  { %s374_s16 = scalar_lea.vmem %s18_s8, 256  ;;  %p379_p12 = scmp.lt.s32.totalorder %s18_s8, %s18_s8 }
  0x1a   :  { %p375_p11 = scmp.ne.s32.totalorder %s18_s8, %s374_s16  ;;  %p380_p13 = scmp.lt.s32.totalorder %s374_s16, %s374_s16 }
  0x1c   :  { %p381_p0 = por %p380_p13, %p379_p12 }
  0x1e   :  { %p382_p1 = pnand %p381_p0, %p375_p11 }
  0x20   :  { %385 = shalt.err (!%p382_p1)
}
  0x21   :  { %s416_s1 = smov 128   ;;  %s417_s17 = smov 8  }
  0x22   :  { %23 = dma.hbm_to_vmem [thread:$0]  %s505_s0, 256, %s18_s8, [#allocation3], %s416_s1, %s416_s1, %s417_s17  }
  0x23   :  { %s418_s20 = smov [#allocation6]   ;;  %s386_s24 = scalar_lea.hbm %s508_s3, 1024 }
  0x24   :  { %s43_s21 = sshll.u32 %s418_s20, 4  ;;  %p387_p2 = scmp.ne.s32.totalorder %s508_s3, %s386_s24  ;;  %s44_s21 = int_to_ptr.vmem [resolvable:$true] %s43_s21 }
  0x25   :  { %p390_p3 = scmp.lt.u32.totalorder %s386_s24, %s508_s3 }
  0x27   :  { %p392_p4 = pnand %p390_p3, %p387_p2 }
  0x29   :  { %395 = shalt.err (!%p392_p4)
}
  0x2a   :  { %s396_s6 = scalar_lea.vmem %s44_s21, 1024  ;;  %p401_p6 = scmp.lt.s32.totalorder %s44_s21, %s44_s21 }
  0x2b   :  { %p397_p5 = scmp.ne.s32.totalorder %s44_s21, %s396_s6  ;;  %p402_p7 = scmp.lt.s32.totalorder %s396_s6, %s396_s6 }
  0x2d   :  { %p403_p8 = por %p402_p7, %p401_p6 }
  0x2f   :  { %p404_p9 = pnand %p403_p8, %p397_p5 }
  0x31   :  { %407 = shalt.err (!%p404_p9)
}
  0x32   :  { %49 = dma.hbm_to_vmem [thread:$0]  %s508_s3, 1024, %s44_s21, [#allocation5], %s413_s28, %s413_s28, %s414_s29  }
  0x33   :  { %408 = dma.done.wait [#allocation3], 256  }
  0x34   :  { %409 = vsyncadd [#allocation3], 4294967040 }
  0x35   :  { %410 = dma.done.wait [#allocation5], 1152  }
  0x36   :  { %411 = vsyncadd [#allocation5], 4294966144  ;;  %v419_v0 = vmov 0.0   ;;  %vm420_vm0 = vmmov 0   ;;  %v325_v1 = vld [vmem:[#allocation4] sm:$0xff]   ;;  %v62_v2 = vld [vmem:[#allocation2] sm:$0xff] }
  0x37   :  { %290 = vmatprep.subr.bf16.mxu0 %v419_v0  ;;  %292 = vmatprep.mubr.msk.bf16.mxu0 %vm420_vm0, %v419_v0  ;;  %v63_v3 = vld [vmem:[#allocation2 + $0x8] sm:$0xff]  ;;  %vm80_vm1 = vcmask 130048   ;;  %v326_v5 = vld [vmem:[#allocation6] sm:$0xff]   ;;  %v327_v6 = vld [vmem:[#allocation6 + $0x8] sm:$0xff]   ;;  %vm258_vm2 = vcmask 64512  }
  0x38   :  { %296 = vmatprep.subr.bf16.mxu1 %v419_v0  ;;  %312 = vmatprep.mubr.msk.bf16.mxu1 %vm420_vm0, %v419_v0  ;;  %v64_v4 = vpack.c.bf16 %v63_v3, %v62_v2  ;;  %v328_v7 = vld [vmem:[#allocation6 + $0x10] sm:$0xff]   ;;  %v329_v8 = vld [vmem:[#allocation6 + $0x18] sm:$0xff]   ;;  %v330_v9 = vld [vmem:[#allocation6 + $0x20] sm:$0xff]  }
  0x39   :  { %291 = vmatpush3.bf16.msra.mxu0 %v325_v1  ;;  %297 = vmatpush3.bf16.msra.mxu1 %v326_v5  ;;  %v331_v10 = vld [vmem:[#allocation6 + $0x28] sm:$0xff]   ;;  %v332_v11 = vld [vmem:[#allocation6 + $0x30] sm:$0xff]   ;;  %v333_v12 = vld [vmem:[#allocation6 + $0x38] sm:$0xff]  }
  0x3a   :  { %298 = vmatprep.subr.bf16.mxu1 %v419_v0  ;;  %v267_v13 = vld [vmem:[%s507_s2] ss:$0 sm:$0xff] }
  0x3b   :  { %v270_v23 = vld [vmem:[%s509_s4] ss:$0 sm:$0xff] }
  0x3c   :  { %293 = vmatmul.mubr.msk.bf16.vlgmr.msra.gmra.mrb[0].mxu0 %vm80_vm1, %v64_v4 }
  0x3d   :  { %299 = vmatpush3.bf16.msra.mxu1 %v327_v6 }
  0x3e   :  { %300 = vmatprep.subr.bf16.mxu1 %v419_v0 }
  0x41   :  { %301 = vmatpush3.bf16.msra.mxu1 %v328_v7 }
  0x42   :  { %302 = vmatprep.subr.bf16.mxu1 %v419_v0 }
  0x45   :  { %303 = vmatpush3.bf16.msra.mxu1 %v329_v8 }
  0x46   :  { %304 = vmatprep.subr.bf16.mxu1 %v419_v0 }
  0x49   :  { %305 = vmatpush3.bf16.msra.mxu1 %v330_v9 }
  0x4a   :  { %306 = vmatprep.subr.bf16.mxu1 %v419_v0 }
  0x4d   :  { %307 = vmatpush3.bf16.msra.mxu1 %v331_v10 }
  0x4e   :  { %308 = vmatprep.subr.bf16.mxu1 %v419_v0 }
  0x51   :  { %309 = vmatpush3.bf16.msra.mxu1 %v332_v11 }
  0x52   :  { %310 = vmatprep.subr.bf16.mxu1 %v419_v0 }
  0x55   :  { %311 = vmatpush3.bf16.msra.mxu1 %v333_v12 }
 0x10f   :  { %v118_v14 = vpop.f32.mrb[0].mxu0 }
 0x110   :  { %v119_v15 = vadd.f32 %v267_v13, %v118_v14  ;;  %v294_v16 = vpop.f32.mrb[1].mxu0 }
 0x111   :  { %v121_v17 = vpop.f32.mrb[2].mxu0 }
 0x112   :  { %v122_v18 = vadd.f32 %v267_v13, %v121_v17  ;;  %v295_v19 = vpop.f32.mrb[3].mxu0  ;;  %v125_v20 = vmax.f32 %v119_v15, 0.0 }
 0x114   :  { %v126_v21 = vmax.f32 %v122_v18, 0.0 }
 0x116   :  { %v127_v22 = vpack.c.bf16 %v126_v21, %v125_v20 }
 0x118   :  { %313 = vmatmul.mubr.bf16.vlgmr.msra.gmra.mrb[0].mxu1 %v127_v22 }
 0x1eb   :  { %v233_v24 = vpop.f32.mrb[0].mxu1 }
 0x1ec   :  { %v234_v25 = vadd.f32 %v270_v23, %v233_v24  ;;  %v314_v26 = vpop.f32.mrb[1].mxu1 }
 0x1ed   :  { %v236_v27 = vpop.f32.mrb[2].mxu1 }
 0x1ee   :  { %240 = vmax.xlane.f32.xlu0 %v234_v25  ;;  %v315_v28 = vpop.f32.mrb[3].mxu1  ;;  %v237_v29 = vadd.f32 %v270_v23, %v236_v27 }
 0x1f2   :  { %242 = vmax.xlane.f32.xlu0 %v237_v29 }
 0x27b   :  { %v241_v30 = vpop.xlane.xlu0 %240 }
 0x27c   :  { %v244_v31 = vsub.f32 %v234_v25, %v241_v30 }
 0x27e   :  { %v246_v32 = vmul.f32 1.442695, %v244_v31 }
 0x27f   :  { %v243_v33 = vpop.xlane.xlu0 %242 }
 0x280   :  { %334 = vpow2.f32 %v246_v32  ;;  %v245_v34 = vsub.f32 %v237_v29, %v243_v33 }
 0x282   :  { %v248_v35 = vmul.f32 1.442695, %v245_v34 }
 0x284   :  { %336 = vpow2.f32 %v248_v35 }
 0x28a   :  { %v335_v36 = vpop.eup %334 }
 0x28b   :  { %250 = vadd.xlane.f32.xlu1 %v335_v36 }
 0x28e   :  { %v337_v37 = vpop.eup %336 }
 0x28f   :  { %252 = vadd.xlane.f32.xlu1 %v337_v37 }
 0x318   :  { %v251_v38 = vpop.xlane.xlu1 %250 }
 0x319   :  { %338 = vrcp.f32 %v251_v38 }
 0x31c   :  { %v253_v39 = vpop.xlane.xlu1 %252 }
 0x31d   :  { %340 = vrcp.f32 %v253_v39 }
 0x323   :  { %v339_v40 = vpop.eup %338 }
 0x324   :  { %v255_v41 = vmul.f32 %v339_v40, %v335_v36 }
 0x326   :  { %259 = vst.msk [vmem:[%s510_s5] sm:$0xff] %vm258_vm2, %v255_v41 }
 0x327   :  { %v341_v42 = vpop.eup %340 }
 0x328   :  { %v257_v43 = vmul.f32 %v341_v42, %v337_v37 }
 0x32a   :  { %260 = vst.msk [vmem:[%s510_s5 + $0x8] sm:$0xff] %vm258_vm2, %v257_v43 }
 0x32b   :  { %265 = vsyncpa [#allocation3], 1 }
 0x32c   :  { %266 = vsyncpa [#allocation5], 1 }

</bundles_post_ra>
